<compile_context>
chip_gen: v7x
topology: tpu7x:2x2x1
jax: 0.10.0
libtpu: 0.0.40
codegen_flags: <defaults>
</compile_context>

<pallas_src>
import functools

import jax
import jax.numpy as jnp
from jax.experimental import pallas as pl
from jax.experimental.pallas import tpu as pltpu


_MIB = 1024 * 1024
# Conservative resident-tile budget, safe on every generation
# (v7x has only 64 MiB physical VMEM; v5e/v6e have 128 MiB).
_DEFAULT_VMEM_BUDGET = 32 * _MIB


def _round_up(x, m):
    return ((x + m - 1) // m) * m


def _choose_k(K):
    """Pick (tk, Kpad) with Kpad % tk == 0; prefer deep MXU contractions."""
    kpad0 = _round_up(K, 128)
    if kpad0 <= 2048:
        return kpad0, kpad0                      # single K block
    for tk in (1024, 896, 768, 640, 512):
        if kpad0 % tk == 0:
            return tk, kpad0
    # No nice divisor (e.g. Cin=320 -> Kpad0=2944): pad K up instead of
    # collapsing to a 128-deep contraction. Zero columns are folded into the
    # tap concat / weight pad, so this is cheap.
    return 512, _round_up(kpad0, 512)


def _choose_n(Cout):
    """Pick (tn, Npad) with Npad % tn == 0; lane-dense (multiple of 128)."""
    npad0 = _round_up(Cout, 128)
    if npad0 <= 1024:
        return npad0, npad0                      # single N block
    for tn in (1024, 896, 768, 640, 512):
        if npad0 % tn == 0:
            return tn, npad0
    return 512, _round_up(npad0, 512)


def _choose_tm(M, tm):
    """Large row tile for reuse, but >=2 blocks so both v7x TCs get work."""
    if M >= 2 * tm:
        return tm
    if M >= 16:
        return max(8, _round_up((M + 1) // 2, 8))
    return M                                     # tiny problem: one full block


def _footprint_bytes(tm, tk, tn, cbytes, obytes, with_acc):
    """VMEM tile footprint (double-buffered inputs/outputs + f32 acc)."""
    patches = 2 * tm * tk * cbytes
    weight = 2 * tk * tn * cbytes
    bias = 2 * tn * 4
    out = 2 * tm * tn * obytes
    acc = tm * tn * 4 if with_acc else 0
    return patches + weight + bias + out + acc


def _conv_kernel_wstationary(p_ref, w_ref, b_ref, o_ref):
    # Full weight is VMEM-resident (constant index map -> one HBM load total).
    # One MXU matmul per output row-tile; bias added in f32 before downcast.
    o_ref[...] = (
        jnp.dot(p_ref[...], w_ref[...], preferred_element_type=jnp.float32)
        + b_ref[...]
    ).astype(o_ref.dtype)


def _conv_kernel_ktiled(p_ref, w_ref, b_ref, o_ref, acc_ref):
    # K is the trailing "arbitrary" reduction axis; f32 accumulator in VMEM.
    # Bias folded into the k==0 init so the epilogue is just a cast.
    k = pl.program_id(2)

    @pl.when(k == 0)
    def _():
        acc_ref[...] = jnp.broadcast_to(b_ref[...], acc_ref.shape)

    acc_ref[...] += jnp.dot(p_ref[...], w_ref[...],
                            preferred_element_type=jnp.float32)

    @pl.when(k == pl.num_programs(2) - 1)
    def _():
        o_ref[...] = acc_ref[...].astype(o_ref.dtype)


def downsample2d(x_nchw, weight, bias, *, tm=1024,
                 compute_dtype=jnp.bfloat16,
                 vmem_budget_bytes=_DEFAULT_VMEM_BUDGET):
    """Conv2d(in_ch, out_ch, kernel_size=3, stride=2, padding=1), NCHW in/out."""
    B, Cin, H, W = x_nchw.shape
    Cout = weight.shape[0]
    kh = kw = 3
    stride = 2
    pad = 1
    Ho = (H + 2 * pad - kh) // stride + 1
    Wo = (W + 2 * pad - kw) // stride + 1
    M = B * Ho * Wo
    K = kh * kw * Cin
    out_dtype = x_nchw.dtype
    cbytes = jnp.dtype(compute_dtype).itemsize
    obytes = jnp.dtype(out_dtype).itemsize

    # ---- tiling / path selection (static, trace-time) ----
    tm_eff = _choose_tm(M, tm)
    kpad0 = _round_up(K, 128)
    npad0 = _round_up(Cout, 128)

    stationary = False
    for tm_try in (tm_eff, min(tm_eff, 512), min(tm_eff, 256)):
        if _footprint_bytes(tm_try, kpad0, npad0, cbytes, obytes,
                            with_acc=False) <= vmem_budget_bytes:
            stationary = True
            tm_eff = tm_try
            tk, Kpad = kpad0, kpad0
            tn, Npad = npad0, npad0
            break
    if not stationary:
        tk, Kpad = _choose_k(K)
        tn, Npad = _choose_n(Cout)

    grid_m = pl.cdiv(M, tm_eff)
    grid_n = Npad // tn
    grid_k = Kpad // tk

    # ---- host-side glue: NCHW -> NHWC (bf16), spatial pad, 9-tap im2col ----
    x = jnp.transpose(x_nchw, (0, 2, 3, 1)).astype(compute_dtype)   # (B,H,W,Cin)
    xp = jnp.pad(x, ((0, 0), (pad, pad), (pad, pad), (0, 0)))

    taps = []
    for i in range(kh):
        for j in range(kw):
            taps.append(
                jax.lax.slice(
                    xp,
                    (0, i, j, 0),
                    (B, i + stride * (Ho - 1) + 1, j + stride * (Wo - 1) + 1, Cin),
                    (1, stride, stride, 1),
                ))                                                  # (B,Ho,Wo,Cin)
    if Kpad != K:
        # K zero-padding folded into the concat (no extra full-array pad pass).
        taps.append(jnp.zeros((B, Ho, Wo, Kpad - K), dtype=compute_dtype))
    patches = jnp.concatenate(taps, axis=-1).reshape(M, Kpad)       # (M, Kpad)

    # weight: (Cout, Cin, 3, 3) -> (3, 3, Cin, Cout) -> (K, Cout); zero-pad to
    # (Kpad, Npad) matching the tap concat order [(i, j) outer, Cin inner].
    wmat = jnp.transpose(weight, (2, 3, 1, 0)).reshape(K, Cout)
    wmat = jnp.pad(wmat, ((0, Kpad - K), (0, Npad - Cout))).astype(compute_dtype)
    bmat = jnp.pad(bias.reshape(1, Cout).astype(jnp.float32),
                   ((0, 0), (0, Npad - Cout)))                      # (1, Npad) f32

    # ---- pallas_call setup ----
    footprint = _footprint_bytes(tm_eff, tk, tn, cbytes, obytes,
                                 with_acc=(grid_k > 1))
    vmem_limit = int(min(max(footprint + 12 * _MIB, 24 * _MIB), 48 * _MIB))

    cost = pl.CostEstimate(
        flops=2 * M * Kpad * Npad,
        transcendentals=0,
        bytes_accessed=(M * Kpad * cbytes * grid_n
                        + Kpad * Npad * cbytes * (1 if stationary else grid_m)
                        + Npad * 4 + M * Npad * obytes),
    )

    if stationary:
        grid = (grid_m,)
        in_specs = [
            pl.BlockSpec((tm_eff, Kpad), lambda i: (i, 0)),
            # Full weight, constant index map -> fetched once, VMEM-resident.
            # (pl.Buffered(1) would halve its VMEM; kept default for safety.)
            pl.BlockSpec((Kpad, Npad), lambda i: (0, 0)),
            pl.BlockSpec((1, Npad), lambda i: (0, 0)),
        ]
        out_spec = pl.BlockSpec((tm_eff, Npad), lambda i: (i, 0))
        scratch = []
        kernel = _conv_kernel_wstationary
        dims = ("parallel",)
    else:
        grid = (grid_m, grid_n, grid_k)                    # reduction axis last
        in_specs = [
            pl.BlockSpec((tm_eff, tk), lambda i, j, k: (i, k)),
            pl.BlockSpec((tk, tn), lambda i, j, k: (k, j)),
            pl.BlockSpec((1, tn), lambda i, j, k: (0, j)),
        ]
        out_spec = pl.BlockSpec((tm_eff, tn), lambda i, j, k: (i, j))
        scratch = [pltpu.VMEM((tm_eff, tn), jnp.float32)]
        kernel = _conv_kernel_ktiled
        dims = ("parallel", "parallel", "arbitrary")

    out = pl.pallas_call(
        kernel,
        out_shape=jax.ShapeDtypeStruct((M, Npad), out_dtype),
        grid_spec=pltpu.PrefetchScalarGridSpec(
            num_scalar_prefetch=0,
            grid=grid,
            in_specs=in_specs,
            out_specs=out_spec,
            scratch_shapes=scratch,
        ),
        compiler_params=pltpu.CompilerParams(
            dimension_semantics=dims,
            vmem_limit_bytes=vmem_limit,
        ),
        cost_estimate=cost,
    )(patches, wmat, bmat)

    out = out[:, :Cout].reshape(B, Ho, Wo, Cout)
    return jnp.transpose(out, (0, 3, 1, 2)).astype(out_dtype)       # NCHW


def _reference_conv(x_nchw, weight, bias):
    out = jax.lax.conv_general_dilated(
        x_nchw, weight,
        window_strides=(2, 2),
        padding=((1, 1), (1, 1)),
        dimension_numbers=("NCHW", "OIHW", "NCHW"),
    )
    return out + bias.reshape(1, -1, 1, 1)


if __name__ == "__main__":
    key = jax.random.PRNGKey(0)

    def _make(k, B, Cin, Cout, H, W):
        k_x, k_w, k_b = jax.random.split(k, 3)
        x = jax.random.normal(k_x, (B, Cin, H, W), dtype=jnp.float32)
        fan_in = Cin * 9
        w = jax.random.normal(k_w, (Cout, Cin, 3, 3), dtype=jnp.float32) / jnp.sqrt(fan_in)
        b = jax.random.normal(k_b, (Cout,), dtype=jnp.float32) * 0.1
        return x, w, b

    k0, k1 = jax.random.split(key)

    # --- primary check: small module-like shape (weight-stationary path) ---
    x, w, b = _make(k0, B=2, Cin=4, Cout=8, H=16, W=16)
    y = jax.block_until_ready(jax.jit(downsample2d)(x, w, b))
    y_ref = jax.block_until_ready(_reference_conv(x, w, b))
    assert y.shape == (2, 8, 8, 8), y.shape
    # bf16 operands (f32 accumulation) vs f32 XLA reference -> relaxed tolerance
    assert jnp.allclose(y, y_ref, atol=5e-2, rtol=5e-2), float(jnp.max(jnp.abs(y - y_ref)))

    # --- secondary check: force the K-tiled reduction fallback path ---
    x2, w2, b2 = _make(k1, B=1, Cin=256, Cout=32, H=8, W=8)
    fwd_tiled = jax.jit(functools.partial(downsample2d, vmem_budget_bytes=1 * _MIB))
    y2 = jax.block_until_ready(fwd_tiled(x2, w2, b2))
    y2_ref = jax.block_until_ready(_reference_conv(x2, w2, b2))
    assert y2.shape == (1, 32, 4, 4), y2.shape
    assert jnp.allclose(y2, y2_ref, atol=5e-2, rtol=5e-2), float(jnp.max(jnp.abs(y2 - y2_ref)))

    print("KERNEL_OK")
</pallas_src>

<mosaic_0001>
module attributes {stable_mosaic.version = 11 : i64} {
  func.func @_conv_kernel_wstationary(%arg0: i32, %arg1: memref<64x128xbf16, #tpu.memory_space<vmem>>, %arg2: memref<128x128xbf16, #tpu.memory_space<vmem>>, %arg3: memref<1x128xf32, #tpu.memory_space<vmem>>, %arg4: memref<64x128xf32, #tpu.memory_space<vmem>>) attributes {dimension_semantics = [#tpu.dimension_semantics<parallel>], iteration_bounds = array<i64: 2>, scalar_prefetch = 0 : i64, scratch_operands = 0 : i64, tpu.core_type = #tpu.core_type<tc>, window_params = [{transform_indices = @transform_0, window_bounds = array<i64: 64, 128>}, {pipeline_mode = #tpu.pipeline_mode<synchronous>, transform_indices = @transform_1, window_bounds = array<i64: 128, 128>}, {pipeline_mode = #tpu.pipeline_mode<synchronous>, transform_indices = @transform_2, window_bounds = array<i64: 1, 128>}, {transform_indices = @transform_3, window_bounds = array<i64: 64, 128>}]} {
    %c0 = arith.constant 0 : index
    %c0_0 = arith.constant 0 : index
    %0 = vector.load %arg1[%c0, %c0_0] : memref<64x128xbf16, #tpu.memory_space<vmem>>, vector<64x128xbf16>
    %c0_1 = arith.constant 0 : index
    %c0_2 = arith.constant 0 : index
    %1 = vector.load %arg2[%c0_1, %c0_2] : memref<128x128xbf16, #tpu.memory_space<vmem>>, vector<128x128xbf16>
    %cst = arith.constant dense<0.000000e+00> : vector<64x128xf32>
    %2 = tpu.matmul %0, %1, %cst {dimension_numbers = #tpu.dot_dimension_numbers<[1], [0], [0], [1], [0, 0, 1, 1], [], []>} : vector<64x128xbf16>, vector<128x128xbf16>, vector<64x128xf32> -> vector<64x128xf32>
    %c0_3 = arith.constant 0 : index
    %c0_4 = arith.constant 0 : index
    %3 = vector.load %arg3[%c0_3, %c0_4] : memref<1x128xf32, #tpu.memory_space<vmem>>, vector<1x128xf32>
    %4 = vector.broadcast %3 : vector<1x128xf32> to vector<64x128xf32>
    %5 = arith.addf %2, %4 : vector<64x128xf32>
    %c0_5 = arith.constant 0 : index
    %c0_6 = arith.constant 0 : index
    %6 = vector.load %arg4[%c0_5, %c0_6] : memref<64x128xf32, #tpu.memory_space<vmem>>, vector<64x128xf32>
    tpu.vector_store %arg4[%c0_5, %c0_6], %5 {strides = array<i32>} : memref<64x128xf32, #tpu.memory_space<vmem>>, vector<64x128xf32>,
    return
  }
  func.func @transform_0(%arg0: i32) -> (i32, i32) {
    %c0_i32 = arith.constant 0 : i32
    %c0_i32_0 = arith.constant 0 : i32
    return %arg0, %c0_i32 : i32, i32
  }
  func.func @transform_1(%arg0: i32) -> (i32, i32) {
    %c0_i32 = arith.constant 0 : i32
    %c0_i32_0 = arith.constant 0 : i32
    %c0_i32_1 = arith.constant 0 : i32
    return %c0_i32, %c0_i32_0 : i32, i32
  }
  func.func @transform_2(%arg0: i32) -> (i32, i32) {
    %c0_i32 = arith.constant 0 : i32
    %c0_i32_0 = arith.constant 0 : i32
    %c0_i32_1 = arith.constant 0 : i32
    return %c0_i32, %c0_i32_0 : i32, i32
  }
  func.func @transform_3(%arg0: i32) -> (i32, i32) {
    %c0_i32 = arith.constant 0 : i32
    %c0_i32_0 = arith.constant 0 : i32
    return %arg0, %c0_i32 : i32, i32
  }
}

</mosaic_0001>

<bundles_post_ra>
// kernel: downsample2d.1
= control target key start
LH: loop header
LB: loop body
LE: loop exit
PB: predicated region body
PF: predicated region fallthrough
CT: control target
= control target key end

     0   :  { %s531_s12 = smov 0   ;;  %s585_s0 = inlined_call_operand.vmem [shape: bf16[128,128], index: 0, kind: input, shape index: {}]   ;;  %s586_s1 = inlined_call_operand.vmem [shape: bf16[128,128], index: 1, kind: input, shape index: {}]   ;;  %s587_s2 = inlined_call_operand.vmem [shape: f32[1,128], index: 2, kind: input, shape index: {}]   ;;  %s588_s3 = inlined_call_operand.vmem [shape: f32[128,128], index: 3, kind: output, shape index: {}]  }
   0x1 LB: > { %s407_s13 = sadd.s32 4294967295, %s509_s12   ;;  %p411_p0 = scmp.ge.s32.totalorder %s509_s12, 1  ;;  %s509_s12 = sphi %s531_s12, %s13_s12  }
   0x2   : > { %p138_p1 = scmp.lt.s32.totalorder %s509_s12, 3 }
   0x4   : > { %p139_p2 = pnand %p411_p0, %p138_p1 }
   0x5   : > { %v491_v0 = vld [vmem:[%s586_s1] sm:$0xff] (!%p139_p2)   ;;  %s412_s16 = sshll.u32 (!%p139_p2), %s407_s13, 3  ;;  %v492_v1 = vld [vmem:[%s586_s1 + $0x8] sm:$0xff] (!%p139_p2)   ;;  %v493_v2 = vld [vmem:[%s586_s1 + $0x10] sm:$0xff] (!%p139_p2)  }
   0x6   : > { %142 = sbr.rel (%p139_p2) target bundleno = 256 (0x100), region = 32  ;;  %p163_p3 = scmp.lt.s32.totalorder (!%p139_p2), %s412_s16, 15  ;;  %443 = vmatprep.subr.bf16.mxu0 (!%p139_p2), %v491_v0  ;;  %467 = vmatprep.subr.bf16.mxu1 (!%p139_p2), %v491_v0  ;;  %v494_v3 = vld [vmem:[%s586_s1 + $0x18] sm:$0xff] (!%p139_p2)   ;;  %v495_v6 = vld [vmem:[%s586_s1 + $0x20] sm:$0xff] (!%p139_p2)   ;;  %v496_v7 = vld [vmem:[%s586_s1 + $0x28] sm:$0xff] (!%p139_p2)  }
   0x7   : > { %444 = vmatpush3.bf16.msra.mxu0 (!%p139_p2), %v491_v0  ;;  %475 = vmatpush3.bf16.msra.mxu1 (!%p139_p2), %v491_v0  ;;  %v497_v8 = vld [vmem:[%s586_s1 + $0x30] sm:$0xff] (!%p139_p2)   ;;  %v498_v9 = vld [vmem:[%s586_s1 + $0x38] sm:$0xff] (!%p139_p2)   ;;  %v416_v12 = vld [vmem:[%s587_s2] ss:$0 sm:$0xff] (!%p139_p2) }
   0x8   : > { %445 = vmatprep.subr.bf16.mxu0 (!%p139_p2), %v492_v1  ;;  %468 = vmatprep.subr.bf16.mxu1 (!%p139_p2), %v492_v1 }
   0xb   : > { %446 = vmatpush3.bf16.msra.mxu0 (!%p139_p2), %v492_v1  ;;  %476 = vmatpush3.bf16.msra.mxu1 (!%p139_p2), %v492_v1 }
   0xc   : > { %447 = vmatprep.subr.bf16.mxu0 (!%p139_p2), %v493_v2  ;;  %469 = vmatprep.subr.bf16.mxu1 (!%p139_p2), %v493_v2 }
   0xd   : > { %s590_s16 = smov (!%p163_p3, %s412_s16), 15 }
   0xe   : > { %s413_s21 = sshll.u32 %s590_s16, 2  ;;  %s415_s8 = sshll.u32 %s590_s16, 3 }
   0xf   : > { %s554_s24 = scalar_lea.vmem %s585_s0, %s413_s21  ;;  %448 = vmatpush3.bf16.msra.mxu0 %v493_v2  ;;  %477 = vmatpush3.bf16.msra.mxu1 %v493_v2  ;;  %s172_s14 = scalar_lea.vmem %s588_s3, %s415_s8 }
  0x10   : > { %v499_v4 = vld [vmem:[%s554_s24] sm:$0xff]   ;;  %v500_v5 = vld [vmem:[%s554_s24 + $0x10] sm:$0xff]   ;;  %449 = vmatprep.subr.bf16.mxu0 %v494_v3  ;;  %470 = vmatprep.subr.bf16.mxu1 %v494_v3  ;;  %v501_v10 = vld [vmem:[%s554_s24 + $0x8] sm:$0xff]  }
  0x11   : > { %459 = vmatprep.mubr.bf16.mxu0 %v499_v4  ;;  %463 = vmatprep.mubr.bf16.mxu1 %v500_v5  ;;  %v502_v11 = vld [vmem:[%s554_s24 + $0x18] sm:$0xff]  }
  0x13   : > { %450 = vmatpush3.bf16.msra.mxu0 %v494_v3  ;;  %478 = vmatpush3.bf16.msra.mxu1 %v494_v3 }
  0x14   : > { %451 = vmatprep.subr.bf16.mxu0 %v495_v6  ;;  %471 = vmatprep.subr.bf16.mxu1 %v495_v6 }
  0x17   : > { %452 = vmatpush3.bf16.msra.mxu0 %v495_v6  ;;  %479 = vmatpush3.bf16.msra.mxu1 %v495_v6 }
  0x18   : > { %453 = vmatprep.subr.bf16.mxu0 %v496_v7  ;;  %472 = vmatprep.subr.bf16.mxu1 %v496_v7 }
  0x1b   : > { %454 = vmatpush3.bf16.msra.mxu0 %v496_v7  ;;  %480 = vmatpush3.bf16.msra.mxu1 %v496_v7 }
  0x1c   : > { %455 = vmatprep.subr.bf16.mxu0 %v497_v8  ;;  %473 = vmatprep.subr.bf16.mxu1 %v497_v8 }
  0x1f   : > { %456 = vmatpush3.bf16.msra.mxu0 %v497_v8  ;;  %481 = vmatpush3.bf16.msra.mxu1 %v497_v8 }
  0x20   : > { %457 = vmatprep.subr.bf16.mxu0 %v498_v9  ;;  %474 = vmatprep.subr.bf16.mxu1 %v498_v9 }
  0x23   : > { %458 = vmatpush3.bf16.msra.mxu0 %v498_v9  ;;  %482 = vmatpush3.bf16.msra.mxu1 %v498_v9 }
  0x26   : > { %460 = vmatmul.mubr.bf16.vlgmr.msra.gmra.mrb[0].mxu0 %v501_v10  ;;  %464 = vmatmul.mubr.bf16.vlgmr.msra.gmra.mrb[0].mxu1 %v502_v11 }
  0xf9   : > { %v461_v13 = vpop.f32.mrb[0].mxu0  ;;  %v465_v14 = vpop.f32.mrb[0].mxu1 }
  0xfa   : > { %v321_v15 = vadd.f32 %v461_v13, %v416_v12  ;;  %v337_v16 = vadd.f32 %v465_v14, %v416_v12  ;;  %v312_v17 = vpop.f32.mrb[1].mxu0  ;;  %v328_v18 = vpop.f32.mrb[1].mxu1 }
  0xfb   : > { %v313_v19 = vadd.f32 %v416_v12, %v312_v17  ;;  %v329_v20 = vadd.f32 %v416_v12, %v328_v18  ;;  %v462_v21 = vpop.f32.mrb[2].mxu0  ;;  %v466_v22 = vpop.f32.mrb[2].mxu1 }
  0xfc   : > { %345 = vst [vmem:[%s172_s14 + $0x10] sm:$0xff] %v321_v15  ;;  %349 = vst [vmem:[%s172_s14 + $0x30] sm:$0xff] %v337_v16  ;;  %v324_v23 = vadd.f32 %v462_v21, %v416_v12  ;;  %v340_v24 = vadd.f32 %v466_v22, %v416_v12  ;;  %v315_v25 = vpop.f32.mrb[3].mxu0  ;;  %v331_v26 = vpop.f32.mrb[3].mxu1 }
  0xfd   : > { %343 = vst [vmem:[%s172_s14] sm:$0xff] %v313_v19  ;;  %347 = vst [vmem:[%s172_s14 + $0x20] sm:$0xff] %v329_v20  ;;  %v316_v27 = vadd.f32 %v416_v12, %v315_v25  ;;  %v332_v28 = vadd.f32 %v416_v12, %v331_v26 }
  0xfe   : > { %346 = vst [vmem:[%s172_s14 + $0x18] sm:$0xff] %v324_v23  ;;  %350 = vst [vmem:[%s172_s14 + $0x38] sm:$0xff] %v340_v24 }
  0xff   : > { %344 = vst [vmem:[%s172_s14 + $0x8] sm:$0xff] %v316_v27  ;;  %348 = vst [vmem:[%s172_s14 + $0x28] sm:$0xff] %v332_v28 }
 0x100 PF: > { %s13_s12 = sadd.s32 1, %s509_s12  }
 0x101   : > { %p10_p4 = scmp.ge.s32.totalorder %s13_s12, 4  }
 0x103   :  { %12 = sbr.rel (!%p10_p4) target bundleno = 1 (0x1), region = 62 }

</bundles_post_ra>
